<compile_context>
chip_gen: v6e
topology: v6e:2x2x1
jax: 0.10.0
libtpu: 0.0.40
codegen_flags: <defaults>
</compile_context>

<pallas_src>
from functools import partial

import jax
import jax.numpy as jnp
import numpy as np
from jax.experimental import pallas as pl
from jax.experimental.pallas import tpu as pltpu


def _round_up(v, m):
    return ((v + m - 1) // m) * m


def _choose_tiling(n, tile_n):
    """Pick (tile_rows, padded_n): low pad waste, >=2 tiles for big batches."""
    align = 32                                   # bf16 sublane-pair friendly
    num_tiles = max(1, -(-n // max(tile_n, align)))
    if num_tiles == 1 and n >= 2048:
        num_tiles = 2                            # let v7x shard across both TCs
    tile = _round_up(-(-n // num_tiles), align)  # even split -> small padding
    return tile, tile * num_tiles


# ---------------------------------------------------------------------------
# Kernel
# ---------------------------------------------------------------------------
def _conv_net_kernel(x_ref, w1_ref, b1_ref, w2_ref, b2_ref,
                     w3_ref, b3_ref, w4_ref, b4_ref, out_ref):
    """Fused conv1+relu -> conv2+relu -> fc1+relu -> fc2 -> softmax."""
    tn = x_ref.shape[0]
    out8 = out_ref.shape[1]                       # real classes rounded to 8

    # Weights stay VMEM-resident (constant index_map); load once per tile.
    w1 = w1_ref[...]; b1 = b1_ref[...]
    w2 = w2_ref[...]; b2 = b2_ref[...]
    w3 = w3_ref[...]; b3 = b3_ref[...]
    w4 = w4_ref[...]; b4 = b4_ref[...]

    # Two independent row-halves per tile so one half's MXU work overlaps the
    # other's MXU drain / EUP exp / XLU reductions.
    n_chunks = 2 if (tn % 32 == 0 and tn >= 32) else 1
    rows = tn // n_chunks

    for c in range(n_chunks):
        r0 = c * rows
        x = x_ref[pl.ds(r0, rows), :].astype(jnp.bfloat16)          # (R, 25)

        # conv1 (im2col folded into the weight) -> relu
        h = jnp.dot(x, w1, preferred_element_type=jnp.float32) + b1  # (R, 54)
        h = jnp.maximum(h, 0.0).astype(jnp.bfloat16)

        # conv2 (1x1 spatial output) -> relu
        h = jnp.dot(h, w2, preferred_element_type=jnp.float32) + b2  # (R, 16)
        h = jnp.maximum(h, 0.0).astype(jnp.bfloat16)

        # fcl_1 -> relu
        h = jnp.dot(h, w3, preferred_element_type=jnp.float32) + b3  # (R, 64)
        h = jnp.maximum(h, 0.0).astype(jnp.bfloat16)

        # fc_2 -> softmax.  Padded logit lanes carry a -1e30 bias (logits stay
        # f32), so restricting the softmax to the first `out8` lanes is exact.
        logits = jnp.dot(h, w4, preferred_element_type=jnp.float32) + b4
        logits = logits[:, :out8]                                    # (R, 8)
        m = jnp.max(logits, axis=-1, keepdims=True)
        e = jnp.exp(logits - m)
        denom = jnp.sum(e, axis=-1, keepdims=True)
        p = e * pl.reciprocal(denom, approx=True)

        out_ref[pl.ds(r0, rows), :] = p.astype(out_ref.dtype)        # bf16 store


# ---------------------------------------------------------------------------
# Host-side one-time parameter re-layout (hoisted out of the per-call path)
# ---------------------------------------------------------------------------
def prepare_conv_network(params, *, mm_dtype=jnp.bfloat16):
    """Fold im2col / transposes / padding into device-ready matrices. Run once."""
    w1, b1, w2, b2, w3, b3, w4, b4 = (np.asarray(p, np.float32) for p in params)
    out_size = w4.shape[0]
    out8 = _round_up(max(out_size, 1), 8)         # narrow, lane-cheap output slab
    w4_lanes = 128                                # MXU-native width for GEMM 4

    # conv1: scat[(oh+kh)*5+(ow+kw), oh*3+ow, kh*3+kw] = 1  (im2col fold)
    scat = np.zeros((25, 9, 9), np.float32)
    for oh in range(3):
        for ow in range(3):
            for kh in range(3):
                for kw in range(3):
                    scat[(oh + kh) * 5 + (ow + kw), oh * 3 + ow, kh * 3 + kw] = 1.0
    w1_km = w1.reshape(6, 9).T                                      # (9, 6)
    w1_big = np.einsum("ipk,kc->ipc", scat, w1_km).reshape(25, 54)  # col = p*6+c
    b1_big = np.tile(b1, 9).reshape(1, 54)

    # conv2: (16, 6, 3, 3) -> (54, 16), row = (kh*3+kw)*6 + cin
    w2_r = np.transpose(w2, (2, 3, 1, 0)).reshape(54, 16)
    b2_r = b2.reshape(1, 16)

    # linears: PyTorch stores (out, in); we compute x @ W.T
    w3_r = w3.T                                                     # (16, 64)
    b3_r = b3.reshape(1, 64)
    w4_p = np.zeros((64, w4_lanes), np.float32)
    w4_p[:, :out_size] = w4.T
    b4_p = np.full((1, w4_lanes), -1e30, np.float32)                # exp -> 0
    b4_p[0, :out_size] = b4

    prep = (
        jnp.asarray(w1_big, mm_dtype), jnp.asarray(b1_big, jnp.float32),
        jnp.asarray(w2_r,  mm_dtype), jnp.asarray(b2_r,  jnp.float32),
        jnp.asarray(w3_r,  mm_dtype), jnp.asarray(b3_r,  jnp.float32),
        jnp.asarray(w4_p,  mm_dtype), jnp.asarray(b4_p,  jnp.float32),
    )
    return prep, out_size, out8


# ---------------------------------------------------------------------------
# Forward
# ---------------------------------------------------------------------------
@partial(jax.jit, static_argnames=("out_size", "out8", "tile_n"))
def _forward(x, prep, *, out_size, out8, tile_n):
    w1, b1, w2, b2, w3, b3, w4, b4 = prep
    N = x.shape[0]
    assert x.shape[1:] == (1, 5, 5), "view(-1, 16) requires a (1, 5, 5) input"

    x_flat = x.reshape(N, 25)                     # f32; cast to bf16 in-kernel
    tile_nn, n_pad = _choose_tiling(N, tile_n)
    if n_pad != N:
        x_flat = jnp.pad(x_flat, ((0, n_pad - N), (0, 0)))

    operands = (x_flat, w1, b1, w2, b2, w3, b3, w4, b4)
    in_specs = [pl.BlockSpec((tile_nn, 25), lambda i: (i, 0))]
    for op in operands[1:]:
        # whole-array blocks with constant index_map -> VMEM-resident weights
        in_specs.append(pl.BlockSpec(op.shape, lambda i, nd=op.ndim: (0,) * nd))

    out = pl.pallas_call(
        _conv_net_kernel,
        out_shape=jax.ShapeDtypeStruct((n_pad, out8), jnp.bfloat16),
        grid_spec=pltpu.PrefetchScalarGridSpec(
            num_scalar_prefetch=0,
            grid=(n_pad // tile_nn,),
            in_specs=in_specs,
            out_specs=pl.BlockSpec((tile_nn, out8), lambda i: (i, 0)),
        ),
        compiler_params=pltpu.CompilerParams(
            dimension_semantics=("parallel",),
            vmem_limit_bytes=48 * 1024 * 1024,
        ),
    )(*operands)

    return out[:N, :out_size].astype(jnp.float32)


def conv_network_forward(x, prepared, *, tile_n=4096):
    """x: (N, 1, 5, 5) float32 NCHW.  `prepared` from prepare_conv_network()."""
    prep, out_size, out8 = prepared
    return _forward(x, prep, out_size=out_size, out8=out8, tile_n=tile_n)


# ---------------------------------------------------------------------------
# Pure-JAX f32 reference (matches the PyTorch module) and test harness
# ---------------------------------------------------------------------------
def _reference_forward(x, params):
    w1, b1, w2, b2, w3, b3, w4, b4 = params
    h = jax.lax.conv(x, w1, (1, 1), "VALID") + b1.reshape(1, 6, 1, 1)
    h = jnp.maximum(h, 0.0)                       # MaxPool2d(1,1) is identity
    h = jax.lax.conv(h, w2, (1, 1), "VALID") + b2.reshape(1, 16, 1, 1)
    h = jnp.maximum(h, 0.0)
    h = h.reshape(-1, 16)
    h = jnp.maximum(h @ w3.T + b3, 0.0)
    logits = h @ w4.T + b4
    return jax.nn.softmax(logits, axis=-1)


def init_params(key, output_size=4):
    ks = jax.random.split(key, 8)
    w1 = 0.1 * jax.random.normal(ks[0], (6, 1, 3, 3), jnp.float32)
    b1 = 0.1 * jax.random.normal(ks[1], (6,), jnp.float32)
    w2 = 0.1 * jax.random.normal(ks[2], (16, 6, 3, 3), jnp.float32)
    b2 = 0.1 * jax.random.normal(ks[3], (16,), jnp.float32)
    w3 = 0.1 * jax.random.normal(ks[4], (64, 16), jnp.float32)
    b3 = 0.1 * jax.random.normal(ks[5], (64,), jnp.float32)
    w4 = 0.1 * jax.random.normal(ks[6], (output_size, 64), jnp.float32)
    b4 = 0.1 * jax.random.normal(ks[7], (output_size,), jnp.float32)
    return (w1, b1, w2, b2, w3, b3, w4, b4)


if __name__ == "__main__":
    key = jax.random.PRNGKey(0)
    k_x, k_x2, k_p = jax.random.split(key, 3)

    output_size = 4
    params = init_params(k_p, output_size=output_size)
    prepared = prepare_conv_network(params)       # one-time host re-layout

    def check(x):
        out = jax.block_until_ready(conv_network_forward(x, params_prepared))
        assert out.shape == (x.shape[0], output_size)
        # softmax rows sum to 1 (approx reciprocal + bf16 output -> loose tol)
        assert jnp.allclose(jnp.sum(out, axis=-1), 1.0, atol=1e-2)
        ref = _reference_forward(x, params)
        err = float(jnp.max(jnp.abs(out - ref)))
        assert jnp.allclose(out, ref, atol=2.5e-2), err

    params_prepared = prepared

    # Small canonical case (batch=2).
    x = jax.random.normal(k_x, (2, 1, 5, 5), jnp.float32)
    check(x)

    # Non-aligned batch to exercise padding / the 2-chunk tile path.
    x2 = jax.random.normal(k_x2, (33, 1, 5, 5), jnp.float32)
    check(x2)

    print("KERNEL_OK")
</pallas_src>

<mosaic_0001>
module attributes {stable_mosaic.version = 11 : i64} {
  func.func @_conv_net_kernel(%arg0: i32, %arg1: memref<32x25xf32, #tpu.memory_space<vmem>>, %arg2: memref<25x54xbf16, #tpu.memory_space<vmem>>, %arg3: memref<1x54xf32, #tpu.memory_space<vmem>>, %arg4: memref<54x16xbf16, #tpu.memory_space<vmem>>, %arg5: memref<1x16xf32, #tpu.memory_space<vmem>>, %arg6: memref<16x64xbf16, #tpu.memory_space<vmem>>, %arg7: memref<1x64xf32, #tpu.memory_space<vmem>>, %arg8: memref<64x128xbf16, #tpu.memory_space<vmem>>, %arg9: memref<1x128xf32, #tpu.memory_space<vmem>>, %arg10: memref<32x8xbf16, #tpu.memory_space<vmem>>) attributes {dimension_semantics = [#tpu.dimension_semantics<parallel>], iteration_bounds = array<i64: 1>, scalar_prefetch = 0 : i64, scratch_operands = 0 : i64, tpu.core_type = #tpu.core_type<tc>, window_params = [{transform_indices = @transform_0, window_bounds = array<i64: 32, 25>}, {pipeline_mode = #tpu.pipeline_mode<synchronous>, transform_indices = @transform_1, window_bounds = array<i64: 25, 54>}, {pipeline_mode = #tpu.pipeline_mode<synchronous>, transform_indices = @transform_2, window_bounds = array<i64: 1, 54>}, {pipeline_mode = #tpu.pipeline_mode<synchronous>, transform_indices = @transform_3, window_bounds = array<i64: 54, 16>}, {pipeline_mode = #tpu.pipeline_mode<synchronous>, transform_indices = @transform_4, window_bounds = array<i64: 1, 16>}, {pipeline_mode = #tpu.pipeline_mode<synchronous>, transform_indices = @transform_5, window_bounds = array<i64: 16, 64>}, {pipeline_mode = #tpu.pipeline_mode<synchronous>, transform_indices = @transform_6, window_bounds = array<i64: 1, 64>}, {pipeline_mode = #tpu.pipeline_mode<synchronous>, transform_indices = @transform_7, window_bounds = array<i64: 64, 128>}, {pipeline_mode = #tpu.pipeline_mode<synchronous>, transform_indices = @transform_8, window_bounds = array<i64: 1, 128>}, {transform_indices = @transform_9, window_bounds = array<i64: 32, 8>}]} {
    %c0 = arith.constant 0 : index
    %c0_0 = arith.constant 0 : index
    %0 = vector.load %arg2[%c0, %c0_0] : memref<25x54xbf16, #tpu.memory_space<vmem>>, vector<25x54xbf16>
    %c0_1 = arith.constant 0 : index
    %c0_2 = arith.constant 0 : index
    %1 = vector.load %arg3[%c0_1, %c0_2] : memref<1x54xf32, #tpu.memory_space<vmem>>, vector<1x54xf32>
    %c0_3 = arith.constant 0 : index
    %c0_4 = arith.constant 0 : index
    %2 = vector.load %arg4[%c0_3, %c0_4] : memref<54x16xbf16, #tpu.memory_space<vmem>>, vector<54x16xbf16>
    %c0_5 = arith.constant 0 : index
    %c0_6 = arith.constant 0 : index
    %3 = vector.load %arg5[%c0_5, %c0_6] : memref<1x16xf32, #tpu.memory_space<vmem>>, vector<1x16xf32>
    %c0_7 = arith.constant 0 : index
    %c0_8 = arith.constant 0 : index
    %4 = vector.load %arg6[%c0_7, %c0_8] : memref<16x64xbf16, #tpu.memory_space<vmem>>, vector<16x64xbf16>
    %c0_9 = arith.constant 0 : index
    %c0_10 = arith.constant 0 : index
    %5 = vector.load %arg7[%c0_9, %c0_10] : memref<1x64xf32, #tpu.memory_space<vmem>>, vector<1x64xf32>
    %c0_11 = arith.constant 0 : index
    %c0_12 = arith.constant 0 : index
    %6 = vector.load %arg8[%c0_11, %c0_12] : memref<64x128xbf16, #tpu.memory_space<vmem>>, vector<64x128xbf16>
    %c0_13 = arith.constant 0 : index
    %c0_14 = arith.constant 0 : index
    %7 = vector.load %arg9[%c0_13, %c0_14] : memref<1x128xf32, #tpu.memory_space<vmem>>, vector<1x128xf32>
    %c0_15 = arith.constant 0 : index
    %c0_16 = arith.constant 0 : index
    %8 = vector.load %arg1[%c0_15, %c0_16] : memref<32x25xf32, #tpu.memory_space<vmem>>, vector<16x25xf32>
    %9 = arith.truncf %8 : vector<16x25xf32> to vector<16x25xbf16>
    %cst = arith.constant dense<0.000000e+00> : vector<16x54xf32>
    %10 = tpu.matmul %9, %0, %cst {dimension_numbers = #tpu.dot_dimension_numbers<[1], [0], [0], [1], [0, 0, 1, 1], [], []>} : vector<16x25xbf16>, vector<25x54xbf16>, vector<16x54xf32> -> vector<16x54xf32>
    %11 = vector.broadcast %1 : vector<1x54xf32> to vector<16x54xf32>
    %12 = arith.addf %10, %11 : vector<16x54xf32>
    %cst_17 = arith.constant 0.000000e+00 : f32
    %13 = vector.broadcast %cst_17 : f32 to vector<16x54xf32>
    %14 = arith.maximumf %12, %13 : vector<16x54xf32>
    %15 = arith.truncf %14 : vector<16x54xf32> to vector<16x54xbf16>
    %cst_18 = arith.constant dense<0.000000e+00> : vector<16x16xf32>
    %16 = tpu.matmul %15, %2, %cst_18 {dimension_numbers = #tpu.dot_dimension_numbers<[1], [0], [0], [1], [0, 0, 1, 1], [], []>} : vector<16x54xbf16>, vector<54x16xbf16>, vector<16x16xf32> -> vector<16x16xf32>
    %17 = vector.broadcast %3 : vector<1x16xf32> to vector<16x16xf32>
    %18 = arith.addf %16, %17 : vector<16x16xf32>
    %cst_19 = arith.constant 0.000000e+00 : f32
    %19 = vector.broadcast %cst_19 : f32 to vector<16x16xf32>
    %20 = arith.maximumf %18, %19 : vector<16x16xf32>
    %21 = arith.truncf %20 : vector<16x16xf32> to vector<16x16xbf16>
    %cst_20 = arith.constant dense<0.000000e+00> : vector<16x64xf32>
    %22 = tpu.matmul %21, %4, %cst_20 {dimension_numbers = #tpu.dot_dimension_numbers<[1], [0], [0], [1], [0, 0, 1, 1], [], []>} : vector<16x16xbf16>, vector<16x64xbf16>, vector<16x64xf32> -> vector<16x64xf32>
    %23 = vector.broadcast %5 : vector<1x64xf32> to vector<16x64xf32>
    %24 = arith.addf %22, %23 : vector<16x64xf32>
    %cst_21 = arith.constant 0.000000e+00 : f32
    %25 = vector.broadcast %cst_21 : f32 to vector<16x64xf32>
    %26 = arith.maximumf %24, %25 : vector<16x64xf32>
    %27 = arith.truncf %26 : vector<16x64xf32> to vector<16x64xbf16>
    %cst_22 = arith.constant dense<0.000000e+00> : vector<16x128xf32>
    %28 = tpu.matmul %27, %6, %cst_22 {dimension_numbers = #tpu.dot_dimension_numbers<[1], [0], [0], [1], [0, 0, 1, 1], [], []>} : vector<16x64xbf16>, vector<64x128xbf16>, vector<16x128xf32> -> vector<16x128xf32>
    %29 = vector.broadcast %7 : vector<1x128xf32> to vector<16x128xf32>
    %30 = arith.addf %28, %29 : vector<16x128xf32>
    %31 = vector.extract_strided_slice %30 {offsets = [0, 0], sizes = [16, 8], strides = [1, 1]} : vector<16x128xf32> to vector<16x8xf32>
    %cst_23 = arith.constant dense<0xFF800000> : vector<16xf32>
    %32 = vector.multi_reduction <maximumf>, %31, %cst_23 [1] : vector<16x8xf32> to vector<16xf32>
    %33 = vector.shape_cast %32 : vector<16xf32> to vector<16x1xf32>
    %34 = vector.broadcast %33 : vector<16x1xf32> to vector<16x8xf32>
    %35 = arith.subf %31, %34 : vector<16x8xf32>
    %36 = math.exp %35 : vector<16x8xf32>
    %cst_24 = arith.constant dense<0.000000e+00> : vector<16xf32>
    %37 = vector.multi_reduction <add>, %36, %cst_24 [1] : vector<16x8xf32> to vector<16xf32>
    %38 = vector.shape_cast %37 : vector<16xf32> to vector<16x1xf32>
    %39 = tpu.reciprocal %38 {approx = true} : vector<16x1xf32> -> vector<16x1xf32>
    %40 = vector.broadcast %39 : vector<16x1xf32> to vector<16x8xf32>
    %41 = arith.mulf %36, %40 : vector<16x8xf32>
    %42 = arith.truncf %41 : vector<16x8xf32> to vector<16x8xbf16>
    %c0_25 = arith.constant 0 : index
    %c0_26 = arith.constant 0 : index
    %43 = vector.load %arg10[%c0_25, %c0_26] : memref<32x8xbf16, #tpu.memory_space<vmem>>, vector<16x8xbf16>
    tpu.vector_store %arg10[%c0_25, %c0_26], %42 {strides = array<i32>} : memref<32x8xbf16, #tpu.memory_space<vmem>>, vector<16x8xbf16>,
    %c16 = arith.constant 16 : index
    %c0_27 = arith.constant 0 : index
    %44 = vector.load %arg1[%c16, %c0_27] : memref<32x25xf32, #tpu.memory_space<vmem>>, vector<16x25xf32>
    %45 = arith.truncf %44 : vector<16x25xf32> to vector<16x25xbf16>
    %cst_28 = arith.constant dense<0.000000e+00> : vector<16x54xf32>
    %46 = tpu.matmul %45, %0, %cst_28 {dimension_numbers = #tpu.dot_dimension_numbers<[1], [0], [0], [1], [0, 0, 1, 1], [], []>} : vector<16x25xbf16>, vector<25x54xbf16>, vector<16x54xf32> -> vector<16x54xf32>
    %47 = vector.broadcast %1 : vector<1x54xf32> to vector<16x54xf32>
    %48 = arith.addf %46, %47 : vector<16x54xf32>
    %cst_29 = arith.constant 0.000000e+00 : f32
    %49 = vector.broadcast %cst_29 : f32 to vector<16x54xf32>
    %50 = arith.maximumf %48, %49 : vector<16x54xf32>
    %51 = arith.truncf %50 : vector<16x54xf32> to vector<16x54xbf16>
    %cst_30 = arith.constant dense<0.000000e+00> : vector<16x16xf32>
    %52 = tpu.matmul %51, %2, %cst_30 {dimension_numbers = #tpu.dot_dimension_numbers<[1], [0], [0], [1], [0, 0, 1, 1], [], []>} : vector<16x54xbf16>, vector<54x16xbf16>, vector<16x16xf32> -> vector<16x16xf32>
    %53 = vector.broadcast %3 : vector<1x16xf32> to vector<16x16xf32>
    %54 = arith.addf %52, %53 : vector<16x16xf32>
    %cst_31 = arith.constant 0.000000e+00 : f32
    %55 = vector.broadcast %cst_31 : f32 to vector<16x16xf32>
    %56 = arith.maximumf %54, %55 : vector<16x16xf32>
    %57 = arith.truncf %56 : vector<16x16xf32> to vector<16x16xbf16>
    %cst_32 = arith.constant dense<0.000000e+00> : vector<16x64xf32>
    %58 = tpu.matmul %57, %4, %cst_32 {dimension_numbers = #tpu.dot_dimension_numbers<[1], [0], [0], [1], [0, 0, 1, 1], [], []>} : vector<16x16xbf16>, vector<16x64xbf16>, vector<16x64xf32> -> vector<16x64xf32>
    %59 = vector.broadcast %5 : vector<1x64xf32> to vector<16x64xf32>
    %60 = arith.addf %58, %59 : vector<16x64xf32>
    %cst_33 = arith.constant 0.000000e+00 : f32
    %61 = vector.broadcast %cst_33 : f32 to vector<16x64xf32>
    %62 = arith.maximumf %60, %61 : vector<16x64xf32>
    %63 = arith.truncf %62 : vector<16x64xf32> to vector<16x64xbf16>
    %cst_34 = arith.constant dense<0.000000e+00> : vector<16x128xf32>
    %64 = tpu.matmul %63, %6, %cst_34 {dimension_numbers = #tpu.dot_dimension_numbers<[1], [0], [0], [1], [0, 0, 1, 1], [], []>} : vector<16x64xbf16>, vector<64x128xbf16>, vector<16x128xf32> -> vector<16x128xf32>
    %65 = vector.broadcast %7 : vector<1x128xf32> to vector<16x128xf32>
    %66 = arith.addf %64, %65 : vector<16x128xf32>
    %67 = vector.extract_strided_slice %66 {offsets = [0, 0], sizes = [16, 8], strides = [1, 1]} : vector<16x128xf32> to vector<16x8xf32>
    %cst_35 = arith.constant dense<0xFF800000> : vector<16xf32>
    %68 = vector.multi_reduction <maximumf>, %67, %cst_35 [1] : vector<16x8xf32> to vector<16xf32>
    %69 = vector.shape_cast %68 : vector<16xf32> to vector<16x1xf32>
    %70 = vector.broadcast %69 : vector<16x1xf32> to vector<16x8xf32>
    %71 = arith.subf %67, %70 : vector<16x8xf32>
    %72 = math.exp %71 : vector<16x8xf32>
    %cst_36 = arith.constant dense<0.000000e+00> : vector<16xf32>
    %73 = vector.multi_reduction <add>, %72, %cst_36 [1] : vector<16x8xf32> to vector<16xf32>
    %74 = vector.shape_cast %73 : vector<16xf32> to vector<16x1xf32>
    %75 = tpu.reciprocal %74 {approx = true} : vector<16x1xf32> -> vector<16x1xf32>
    %76 = vector.broadcast %75 : vector<16x1xf32> to vector<16x8xf32>
    %77 = arith.mulf %72, %76 : vector<16x8xf32>
    %78 = arith.truncf %77 : vector<16x8xf32> to vector<16x8xbf16>
    %c16_37 = arith.constant 16 : index
    %c0_38 = arith.constant 0 : index
    %79 = vector.load %arg10[%c16_37, %c0_38] : memref<32x8xbf16, #tpu.memory_space<vmem>>, vector<16x8xbf16>
    tpu.vector_store %arg10[%c16_37, %c0_38], %78 {strides = array<i32>} : memref<32x8xbf16, #tpu.memory_space<vmem>>, vector<16x8xbf16>,
    return
  }
  func.func @transform_0(%arg0: i32) -> (i32, i32) {
    %c0_i32 = arith.constant 0 : i32
    %c0_i32_0 = arith.constant 0 : i32
    return %arg0, %c0_i32 : i32, i32
  }
  func.func @transform_1(%arg0: i32) -> (i32, i32) {
    %c0_i32 = arith.constant 0 : i32
    %c0_i32_0 = arith.constant 0 : i32
    %c0_i32_1 = arith.constant 0 : i32
    return %c0_i32, %c0_i32_0 : i32, i32
  }
  func.func @transform_2(%arg0: i32) -> (i32, i32) {
    %c0_i32 = arith.constant 0 : i32
    %c0_i32_0 = arith.constant 0 : i32
    %c0_i32_1 = arith.constant 0 : i32
    return %c0_i32, %c0_i32_0 : i32, i32
  }
  func.func @transform_3(%arg0: i32) -> (i32, i32) {
    %c0_i32 = arith.constant 0 : i32
    %c0_i32_0 = arith.constant 0 : i32
    %c0_i32_1 = arith.constant 0 : i32
    return %c0_i32, %c0_i32_0 : i32, i32
  }
  func.func @transform_4(%arg0: i32) -> (i32, i32) {
    %c0_i32 = arith.constant 0 : i32
    %c0_i32_0 = arith.constant 0 : i32
    %c0_i32_1 = arith.constant 0 : i32
    return %c0_i32, %c0_i32_0 : i32, i32
  }
  func.func @transform_5(%arg0: i32) -> (i32, i32) {
    %c0_i32 = arith.constant 0 : i32
    %c0_i32_0 = arith.constant 0 : i32
    %c0_i32_1 = arith.constant 0 : i32
    return %c0_i32, %c0_i32_0 : i32, i32
  }
  func.func @transform_6(%arg0: i32) -> (i32, i32) {
    %c0_i32 = arith.constant 0 : i32
    %c0_i32_0 = arith.constant 0 : i32
    %c0_i32_1 = arith.constant 0 : i32
    return %c0_i32, %c0_i32_0 : i32, i32
  }
  func.func @transform_7(%arg0: i32) -> (i32, i32) {
    %c0_i32 = arith.constant 0 : i32
    %c0_i32_0 = arith.constant 0 : i32
    %c0_i32_1 = arith.constant 0 : i32
    return %c0_i32, %c0_i32_0 : i32, i32
  }
  func.func @transform_8(%arg0: i32) -> (i32, i32) {
    %c0_i32 = arith.constant 0 : i32
    %c0_i32_0 = arith.constant 0 : i32
    %c0_i32_1 = arith.constant 0 : i32
    return %c0_i32, %c0_i32_0 : i32, i32
  }
  func.func @transform_9(%arg0: i32) -> (i32, i32) {
    %c0_i32 = arith.constant 0 : i32
    %c0_i32_0 = arith.constant 0 : i32
    return %arg0, %c0_i32 : i32, i32
  }
}

</mosaic_0001>

<bundles_post_ra>
// kernel: _forward.1
= control target key start
LH: loop header
LB: loop body
LE: loop exit
PB: predicated region body
PF: predicated region fallthrough
CT: control target
= control target key end

     0   :  { %vm82_vm0 = vcmask 1043456   ;;  %vm83_vm1 = vcmask 1044480   ;;  %v772_v0 = vmov 0.0   ;;  %v773_v2 = vmov 65535   ;;  %s952_s1 = inlined_call_operand.vmem [shape: bf16[25,54], index: 1, kind: input, shape index: {}]   ;;  %s953_s0 = inlined_call_operand.vmem [shape: f32[32,25], index: 0, kind: input, shape index: {}]   ;;  %s954_s3 = inlined_call_operand.vmem [shape: bf16[54,16], index: 3, kind: input, shape index: {}]   ;;  %s955_s2 = inlined_call_operand.vmem [shape: f32[1,54], index: 2, kind: input, shape index: {}]   ;;  %s956_s5 = inlined_call_operand.vmem [shape: bf16[16,64], index: 5, kind: input, shape index: {}]   ;;  %s957_s7 = inlined_call_operand.vmem [shape: bf16[64,128], index: 7, kind: input, shape index: {}]   ;;  %s958_s4 = inlined_call_operand.vmem [shape: f32[1,16], index: 4, kind: input, shape index: {}]   ;;  %s959_s6 = inlined_call_operand.vmem [shape: f32[1,64], index: 6, kind: input, shape index: {}]   ;;  %s960_s8 = inlined_call_operand.vmem [shape: f32[1,128], index: 8, kind: input, shape index: {}]   ;;  %s961_s9 = inlined_call_operand.vmem [shape: bf16[32,8], index: 9, kind: output, shape index: {}]  }
   0x1   :  { %666 = vmatprep.subr.bf16.mxu1 %v772_v0  ;;  %v745_v1 = vld [vmem:[%s952_s1 + $0x8] sm:$0x1f]   ;;  %686 = vmatprep.subr.bf16.mxu0 %v772_v0  ;;  %v84_v3 = vsel %vm82_vm0, 4294967295, %v773_v2  ;;  %v746_v6 = vld [vmem:[%s952_s1] sm:$0xff]   ;;  %vm774_vm2 = vmmov 0   ;;  %vm164_vm3 = vcmask 1042432  }
   0x2   :  { %v85_v4 = vsel %vm83_vm1, %v84_v3, 0  ;;  %670 = vmatprep.mubr.msk.bf16.mxu1 %vm774_vm2, %v772_v0  ;;  %688 = vmatprep.mubr.msk.bf16.mxu0 %vm774_vm2, %v772_v0  ;;  %v58_v7 = vld [vmem:[%s953_s0] sm:$0xff]  ;;  %v747_v8 = vld [vmem:[%s954_s3 + $0x18] ss:$0 sps:$4 sm:$0x77]   ;;  %v59_v9 = vld [vmem:[%s953_s0 + $0x8] sm:$0xff] }
   0x3   :  { %v87_v5 = vand.u32 %v745_v1, %v85_v4  ;;  %v60_v10 = vpack.c.bf16 %v59_v9, %v58_v7  ;;  %vm78_vm4 = vcmask 203776   ;;  %v166_v11 = vsel %vm164_vm3, %v747_v8, 0  ;;  %v748_v12 = vld [vmem:[%s954_s3 + $0x10] sm:$0xff]   ;;  %v749_v13 = vld [vmem:[%s954_s3 + $0x8] sm:$0xff]   ;;  %v750_v14 = vld [vmem:[%s954_s3] sm:$0xff]  }
   0x4   :  { %v605_v15 = vld [vmem:[%s955_s2] ss:$0 sm:$0xff]  ;;  %vm160_vm5 = vcmask 441344   ;;  %v381_v25 = vld [vmem:[%s953_s0 + $0x10] sm:$0xff]  ;;  %v382_v26 = vld [vmem:[%s953_s0 + $0x18] sm:$0xff]  ;;  %vm224_vm6 = vcmask 130048  }
   0x5   :  { %667 = vmatpush3.bf16.msra.mxu1 %v87_v5  ;;  %v383_v27 = vpack.c.bf16 %v382_v26, %v381_v25  ;;  %v751_v28 = vld [vmem:[%s956_s5] sm:$0xff]   ;;  %v752_v39 = vld [vmem:[%s957_s7 + $0x18] sm:$0xff]   ;;  %v753_v44 = vld [vmem:[%s957_s7 + $0x10] sm:$0xff]   ;;  %vm302_vm7 = vcmask 523264   ;;  %vm347_vm8 = vcmask 64512   ;;  %vm378_vm9 = vcmask 60416  }
   0x6   :  { %668 = vmatprep.subr.bf16.mxu1 %v772_v0  ;;  %687 = vmatpush3.bf16.msra.mxu0 %v751_v28  ;;  %v609_v29 = vld [vmem:[%s958_s4] ss:$0 sm:$0xff]  ;;  %v754_v50 = vld [vmem:[%s957_s7 + $0x8] sm:$0xff]  }
   0x7   :  { %692 = vmatprep.subr.bf16.mxu0 %v772_v0  ;;  %v755_v51 = vld [vmem:[%s957_s7] sm:$0xff]  }
   0x8   :  { %v615_v52 = vld [vmem:[%s959_s6] ss:$0 sm:$0xff] }
   0x9   :  { %669 = vmatpush3.bf16.msra.mxu1 %v746_v6  ;;  %v618_v8 = vld [vmem:[%s960_s8] ss:$0 sm:$0xff] }
   0xa   :  { %674 = vmatprep.subr.bf16.mxu1 %v772_v0 }
   0xc   :  { %671 = vmatmul.mubr.msk.bf16.vlgmr.msra.gmra.mxu1 %vm78_vm4, %v60_v10 }
   0xd   :  { %675 = vmatpush3.bf16.msra.mxu1 %v166_v11  ;;  %682 = vmatprep.mubr.msk.bf16.mxu1 %vm774_vm2, %v772_v0 }
   0xe   :  { %676 = vmatprep.subr.bf16.mxu1 %v772_v0 }
  0x11   :  { %677 = vmatpush3.bf16.msra.mxu1 %v748_v12 }
  0x12   :  { %678 = vmatprep.subr.bf16.mxu1 %v772_v0 }
  0x15   :  { %679 = vmatpush3.bf16.msra.mxu1 %v749_v13 }
  0x16   :  { %680 = vmatprep.subr.bf16.mxu1 %v772_v0 }
  0x19   :  { %681 = vmatpush3.bf16.msra.mxu1 %v750_v14 }
  0x1a   :  { %704 = vmatprep.subr.bf16.mxu1 %v772_v0 }
  0xcc   :  { %v123_v16 = vpop.f32.mrf.mxu1 }
  0xcd   :  { %v124_v18 = vadd.f32 %v605_v15, %v123_v16 }
  0xce   :  { %v672_v17 = vpop.f32.mrf.mxu1 }
  0xcf   :  { %v130_v22 = vmax.f32 %v124_v18, 0.0 }
  0xd0   :  { %v126_v19 = vpop.f32.mrf.mxu1 }
  0xd1   :  { %v127_v20 = vadd.f32 %v605_v15, %v126_v19 }
  0xd2   :  { %v673_v21 = vpop.f32.mrf.mxu1 }
  0xd3   :  { %v131_v23 = vmax.f32 %v127_v20, 0.0 }
  0xd5   :  { %v132_v24 = vpack.c.bf16 %v131_v23, %v130_v22 }
  0xd7   :  { %683 = vmatmul.mubr.msk.bf16.vlgmr.msra.gmra.mxu1 %vm160_vm5, %v132_v24 }
  0xd8   :  { %705 = vmatpush3.bf16.msra.mxu1 %v87_v5  ;;  %708 = vmatprep.mubr.msk.bf16.mxu1 %vm774_vm2, %v772_v0 }
  0xd9   :  { %706 = vmatprep.subr.bf16.mxu1 %v772_v0 }
  0xdc   :  { %707 = vmatpush3.bf16.msra.mxu1 %v746_v6 }
  0xdd   :  { %712 = vmatprep.subr.bf16.mxu1 %v772_v0 }
  0xdf   :  { %709 = vmatmul.mubr.msk.bf16.vlgmr.msra.gmra.mxu1 %vm78_vm4, %v383_v27 }
  0xe0   :  { %713 = vmatpush3.bf16.msra.mxu1 %v166_v11  ;;  %720 = vmatprep.mubr.msk.bf16.mxu1 %vm774_vm2, %v772_v0 }
  0xe1   :  { %714 = vmatprep.subr.bf16.mxu1 %v772_v0 }
  0xe4   :  { %715 = vmatpush3.bf16.msra.mxu1 %v748_v12 }
  0xe5   :  { %716 = vmatprep.subr.bf16.mxu1 %v772_v0 }
  0xe8   :  { %717 = vmatpush3.bf16.msra.mxu1 %v749_v13 }
  0xe9   :  { %718 = vmatprep.subr.bf16.mxu1 %v772_v0 }
  0xec   :  { %719 = vmatpush3.bf16.msra.mxu1 %v750_v14 }
 0x197   :  { %v202_v30 = vpop.f32.mrf.mxu1 }
 0x198   :  { %v203_v32 = vadd.f32 %v609_v29, %v202_v30 }
 0x199   :  { %v684_v31 = vpop.f32.mrf.mxu1 }
 0x19a   :  { %v209_v36 = vmax.f32 %v203_v32, 0.0 }
 0x19b   :  { %v205_v33 = vpop.f32.mrf.mxu1 }
 0x19c   :  { %v206_v34 = vadd.f32 %v609_v29, %v205_v33 }
 0x19d   :  { %v685_v35 = vpop.f32.mrf.mxu1 }
 0x19e   :  { %v210_v37 = vmax.f32 %v206_v34, 0.0 }
 0x19f   :  { %v421_v38 = vpop.f32.mrf.mxu1 }
 0x1a0   :  { %v211_v40 = vpack.c.bf16 %v210_v37, %v209_v36  ;;  %v422_v42 = vadd.f32 %v605_v15, %v421_v38 }
 0x1a1   :  { %v710_v41 = vpop.f32.mrf.mxu1 }
 0x1a2   :  { %689 = vmatmul.mubr.msk.bf16.vlgmr.msra.gmra.mxu0 %vm224_vm6, %v211_v40  ;;  %v428_v47 = vmax.f32 %v422_v42, 0.0 }
 0x1a3   :  { %v424_v43 = vpop.f32.mrf.mxu1  ;;  %693 = vmatpush3.bf16.msra.mxu0 %v752_v39  ;;  %700 = vmatprep.mubr.msk.bf16.mxu0 %vm774_vm2, %v772_v0 }
 0x1a4   :  { %v425_v45 = vadd.f32 %v605_v15, %v424_v43  ;;  %694 = vmatprep.subr.bf16.mxu0 %v772_v0 }
 0x1a5   :  { %v711_v46 = vpop.f32.mrf.mxu1 }
 0x1a6   :  { %v429_v48 = vmax.f32 %v425_v45, 0.0 }
 0x1a7   :  { %695 = vmatpush3.bf16.msra.mxu0 %v753_v44 }
 0x1a8   :  { %v430_v49 = vpack.c.bf16 %v429_v48, %v428_v47  ;;  %696 = vmatprep.subr.bf16.mxu0 %v772_v0 }
 0x1aa   :  { %721 = vmatmul.mubr.msk.bf16.vlgmr.msra.gmra.mxu1 %vm160_vm5, %v430_v49 }
 0x1ab   :  { %697 = vmatpush3.bf16.msra.mxu0 %v754_v50 }
 0x1ac   :  { %698 = vmatprep.subr.bf16.mxu0 %v772_v0 }
 0x1af   :  { %699 = vmatpush3.bf16.msra.mxu0 %v755_v51 }
 0x1b0   :  { %724 = vmatprep.subr.bf16.mxu0 %v772_v0 }
 0x262   :  { %v262_v53 = vpop.f32.mrf.mxu0 }
 0x263   :  { %v263_v55 = vadd.f32 %v615_v52, %v262_v53 }
 0x264   :  { %v690_v54 = vpop.f32.mrf.mxu0 }
 0x265   :  { %v269_v59 = vmax.f32 %v263_v55, 0.0 }
 0x266   :  { %v265_v56 = vpop.f32.mrf.mxu0 }
 0x267   :  { %v266_v57 = vadd.f32 %v615_v52, %v265_v56 }
 0x268   :  { %v691_v58 = vpop.f32.mrf.mxu0 }
 0x269   :  { %v270_v60 = vmax.f32 %v266_v57, 0.0 }
 0x26a   :  { %v468_v61 = vpop.f32.mrf.mxu1 }
 0x26b   :  { %v271_v62 = vpack.c.bf16 %v270_v60, %v269_v59  ;;  %v469_v1 = vadd.f32 %v609_v29, %v468_v61 }
 0x26c   :  { %v722_v63 = vpop.f32.mrf.mxu1 }
 0x26d   :  { %701 = vmatmul.mubr.msk.bf16.vlgmr.msra.gmra.mxu0 %vm302_vm7, %v271_v62  ;;  %v475_v5 = vmax.f32 %v469_v1, 0.0 }
 0x26e   :  { %725 = vmatpush3.bf16.msra.mxu0 %v751_v28  ;;  %v471_v2 = vpop.f32.mrf.mxu1  ;;  %726 = vmatprep.mubr.msk.bf16.mxu0 %vm774_vm2, %v772_v0 }
 0x26f   :  { %v472_v3 = vadd.f32 %v609_v29, %v471_v2  ;;  %730 = vmatprep.subr.bf16.mxu0 %v772_v0 }
 0x270   :  { %v723_v4 = vpop.f32.mrf.mxu1 }
 0x271   :  { %v476_v6 = vmax.f32 %v472_v3, 0.0 }
 0x273   :  { %v477_v7 = vpack.c.bf16 %v476_v6, %v475_v5 }
 0x275   :  { %727 = vmatmul.mubr.msk.bf16.vlgmr.msra.gmra.mxu0 %vm224_vm6, %v477_v7 }
 0x276   :  { %731 = vmatpush3.bf16.msra.mxu0 %v752_v39  ;;  %738 = vmatprep.mubr.msk.bf16.mxu0 %vm774_vm2, %v772_v0 }
 0x277   :  { %732 = vmatprep.subr.bf16.mxu0 %v772_v0 }
 0x27a   :  { %733 = vmatpush3.bf16.msra.mxu0 %v753_v44 }
 0x27b   :  { %734 = vmatprep.subr.bf16.mxu0 %v772_v0 }
 0x27e   :  { %735 = vmatpush3.bf16.msra.mxu0 %v754_v50 }
 0x27f   :  { %736 = vmatprep.subr.bf16.mxu0 %v772_v0 }
 0x282   :  { %737 = vmatpush3.bf16.msra.mxu0 %v755_v51 }
 0x32d   :  { %v340_v9 = vpop.f32.mrf.mxu0 }
 0x32e   :  { %v341_v10 = vadd.f32 %v618_v8, %v340_v9 }
 0x32f   :  { %v702_v11 = vpop.f32.mrf.mxu0 }
 0x330   :  { %v348_v12 = vsel %vm347_vm8, %v341_v10, -inf }
 0x331   :  { %349 = vmax.xlane.f32.xlu0 %v348_v12  ;;  %v343_v13 = vpop.f32.mrf.mxu0 }
 0x332   :  { %v344_v14 = vadd.f32 %v618_v8, %v343_v13 }
 0x333   :  { %v703_v15 = vpop.f32.mrf.mxu0 }
 0x334   :  { %v351_v16 = vsel %vm347_vm8, %v344_v14, -inf }
 0x335   :  { %352 = vmax.xlane.f32.xlu0 %v351_v16  ;;  %v515_v17 = vpop.f32.mrf.mxu0 }
 0x336   :  { %v516_v18 = vadd.f32 %v615_v52, %v515_v17 }
 0x337   :  { %v728_v0 = vpop.f32.mrf.mxu0 }
 0x338   :  { %v522_v22 = vmax.f32 %v516_v18, 0.0 }
 0x339   :  { %v518_v19 = vpop.f32.mrf.mxu0 }
 0x33a   :  { %v519_v20 = vadd.f32 %v615_v52, %v518_v19 }
 0x33b   :  { %v729_v21 = vpop.f32.mrf.mxu0 }
 0x33c   :  { %v523_v23 = vmax.f32 %v519_v20, 0.0 }
 0x33e   :  { %v524_v24 = vpack.c.bf16 %v523_v23, %v522_v22 }
 0x340   :  { %739 = vmatmul.mubr.msk.bf16.vlgmr.msra.gmra.mxu0 %vm302_vm7, %v524_v24 }
 0x3ba   :  { %v350_v25 = vpop.xlane.xlu0 %349 }
 0x3bb   :  { %v354_v26 = vsub.f32 %v341_v10, %v350_v25 }
 0x3bd   :  { %v356_v27 = vmul.f32 1.442695, %v354_v26 }
 0x3be   :  { %v353_v30 = vpop.xlane.xlu0 %352 }
 0x3bf   :  { %756 = vpow2.f32 %v356_v27  ;;  %v355_v31 = vsub.f32 %v344_v14, %v353_v30 }
 0x3c1   :  { %v358_v32 = vmul.f32 1.442695, %v355_v31 }
 0x3c3   :  { %758 = vpow2.f32 %v358_v32 }
 0x3cc   :  { %v757_v28 = vpop.eup %756 }
 0x3cd   :  { %v360_v29 = vsel %vm347_vm8, %v757_v28, 0.0 }
 0x3ce   :  { %361 = vadd.xlane.f32.xlu0 %v360_v29 }
 0x3d0   :  { %v759_v41 = vpop.eup %758 }
 0x3d1   :  { %v363_v42 = vsel %vm347_vm8, %v759_v41, 0.0 }
 0x400   :  { %v562_v33 = vpop.f32.mrf.mxu0 }
 0x401   :  { %v563_v34 = vadd.f32 %v618_v8, %v562_v33 }
 0x402   :  { %v740_v35 = vpop.f32.mrf.mxu0 }
 0x403   :  { %v569_v36 = vsel %vm347_vm8, %v563_v34, -inf }
 0x404   :  { %570 = vmax.xlane.f32.xlu1 %v569_v36  ;;  %v565_v37 = vpop.f32.mrf.mxu0 }
 0x405   :  { %v566_v38 = vadd.f32 %v618_v8, %v565_v37 }
 0x406   :  { %v741_v39 = vpop.f32.mrf.mxu0 }
 0x407   :  { %v572_v40 = vsel %vm347_vm8, %v566_v38, -inf }
 0x408   :  { %573 = vmax.xlane.f32.xlu1 %v572_v40 }
 0x40c   :  { %364 = vadd.xlane.f32.xlu1 %v363_v42 }
 0x457   :  { %v362_v43 = vpop.xlane.xlu0 %361 }
 0x458   :  { %760 = vrcp.f32 %v362_v43 }
 0x465   :  { %v761_v44 = vpop.eup %760 }
 0x466   :  { %v368_v45 = vmul.f32 %v761_v44, %v757_v28 }
 0x468   :  { %v632_v46 = vpack.c.bf16 %v368_v45, %v368_v45 }
 0x46a   :  { %379 = vst.msk [vmem:[%s961_s9] sm:$0xf] %vm378_vm9, %v632_v46 }
 0x48d   :  { %v571_v47 = vpop.xlane.xlu1 %570 }
 0x48e   :  { %v575_v48 = vsub.f32 %v563_v34, %v571_v47 }
 0x490   :  { %v577_v49 = vmul.f32 1.442695, %v575_v48 }
 0x491   :  { %v574_v50 = vpop.xlane.xlu1 %573 }
 0x492   :  { %762 = vpow2.f32 %v577_v49  ;;  %v576_v51 = vsub.f32 %v566_v38, %v574_v50 }
 0x494   :  { %v579_v52 = vmul.f32 1.442695, %v576_v51 }
 0x495   :  { %v365_v53 = vpop.xlane.xlu1 %364 }
 0x496   :  { %764 = vpow2.f32 %v579_v52 }
 0x497   :  { %766 = vrcp.f32 %v365_v53 }
 0x49f   :  { %v763_v54 = vpop.eup %762 }
 0x4a0   :  { %v581_v55 = vsel %vm347_vm8, %v763_v54, 0.0 }
 0x4a1   :  { %582 = vadd.xlane.f32.xlu0 %v581_v55 }
 0x4a3   :  { %v765_v56 = vpop.eup %764 }
 0x4a4   :  { %v767_v57 = vpop.eup %766  ;;  %v584_v58 = vsel %vm347_vm8, %v765_v56, 0.0 }
 0x4a5   :  { %v369_v59 = vmul.f32 %v767_v57, %v759_v41  ;;  %585 = vadd.xlane.f32.xlu1 %v584_v58 }
 0x4a7   :  { %v633_v60 = vpack.c.bf16 %v369_v59, %v369_v59 }
 0x4a9   :  { %380 = vst.msk [vmem:[%s961_s9 + $0x4] sm:$0xf] %vm378_vm9, %v633_v60 }
 0x52a   :  { %v583_v61 = vpop.xlane.xlu0 %582 }
 0x52b   :  { %768 = vrcp.f32 %v583_v61 }
 0x52e   :  { %v586_v62 = vpop.xlane.xlu1 %585 }
 0x52f   :  { %770 = vrcp.f32 %v586_v62 }
 0x538   :  { %v769_v63 = vpop.eup %768 }
 0x539   :  { %v589_v1 = vmul.f32 %v769_v63, %v763_v54 }
 0x53b   :  { %v634_v2 = vpack.c.bf16 %v589_v1, %v589_v1 }
 0x53c   :  { %v771_v3 = vpop.eup %770 }
 0x53d   :  { %599 = vst.msk [vmem:[%s961_s9 + $0x8] sm:$0xf] %vm378_vm9, %v634_v2  ;;  %v590_v4 = vmul.f32 %v771_v3, %v765_v56 }
 0x53f   :  { %v635_v5 = vpack.c.bf16 %v590_v4, %v590_v4 }
 0x541   :  { %600 = vst.msk [vmem:[%s961_s9 + $0xc] sm:$0xf] %vm378_vm9, %v635_v5 }

</bundles_post_ra>
